<compile_context>
chip_gen: v6e
topology: v6e:2x2x1
jax: 0.10.0
libtpu: 0.0.40
codegen_flags: <defaults>
</compile_context>

<pallas_src>
import jax
import jax.numpy as jnp
from jax.experimental import pallas as pl
from jax.experimental.pallas import tpu as pltpu


def _round_up(x, m):
    return ((x + m - 1) // m) * m


# ---------------------------------------------------------------------------
# Kernels
# ---------------------------------------------------------------------------
def _mlp_kernel_resident(x_ref, w1_ref, b1_ref, w2_ref, b2_ref, w3_ref, b3_ref, o_ref):
    # x may arrive as f32 (aligned fast path) or bf16 (padded path); cast on the VPU,
    # hidden under the MXU work.
    x = x_ref[...].astype(w1_ref.dtype)
    # Layer 1: bf16 x bf16 on the MXU, f32 accumulation; bias + ReLU in f32 (VPU).
    h1 = jnp.dot(x, w1_ref[...], preferred_element_type=jnp.float32)
    h1 = jnp.maximum(h1 + b1_ref[...], 0.0).astype(w2_ref.dtype)
    # Layer 2
    h2 = jnp.dot(h1, w2_ref[...], preferred_element_type=jnp.float32)
    h2 = jnp.maximum(h2 + b2_ref[...], 0.0).astype(w3_ref.dtype)
    # Layer 3 (no activation); lane-dense (128-padded) f32 store.
    out = jnp.dot(h2, w3_ref[...], preferred_element_type=jnp.float32) + b3_ref[...]
    o_ref[...] = out.astype(o_ref.dtype)


def _mlp_kernel_ktiled(x_ref, w1_ref, b1_ref, w2_ref, b2_ref, w3_ref, b3_ref, o_ref, acc_ref):
    # Layer-1 K-reduction streamed over d_in tiles (W1 not fully resident); layers 2/3 run
    # once on the last K step. Output block is resident across the K ("arbitrary") axis.
    k = pl.program_id(1)

    @pl.when(k == 0)
    def _():
        acc_ref[...] = jnp.zeros_like(acc_ref)

    x = x_ref[...].astype(w1_ref.dtype)
    acc_ref[...] += jnp.dot(x, w1_ref[...], preferred_element_type=jnp.float32)

    @pl.when(k == pl.num_programs(1) - 1)
    def _():
        h1 = jnp.maximum(acc_ref[...] + b1_ref[...], 0.0).astype(w2_ref.dtype)
        h2 = jnp.dot(h1, w2_ref[...], preferred_element_type=jnp.float32)
        h2 = jnp.maximum(h2 + b2_ref[...], 0.0).astype(w3_ref.dtype)
        out = jnp.dot(h2, w3_ref[...], preferred_element_type=jnp.float32) + b3_ref[...]
        o_ref[...] = out.astype(o_ref.dtype)


# ---------------------------------------------------------------------------
# Sizing helpers
# ---------------------------------------------------------------------------
def _vmem_capacity_bytes():
    """Physical per-core VMEM; conservative 64 MiB (v7x) fallback if the query fails."""
    try:
        info = pltpu.get_tpu_info()
        for name in ("vmem_capacity_bytes", "vmem_size_bytes"):
            v = getattr(info, name, None)
            if v:
                return int(v)
    except Exception:
        pass
    return 64 << 20


def _pick_tile_b(batch, cap=512):
    # One fat tile when the (16-padded) batch fits under the cap -- feeds the 256-wide MXU on
    # v6e/v7x and avoids ~0.35us/step loop overhead; otherwise cap-sized tiles (>=2 steps).
    return min(cap, _round_up(batch, 16))


def _pick_tile_k(d_in_p, target):
    # Largest multiple of 128 that divides d_in_p and is <= target (so K blocks tile exactly).
    n = d_in_p // 128
    best = 128
    for g in range(1, n + 1):
        if n % g == 0 and 128 * g <= max(128, target):
            best = 128 * g
    return best


def _resident_vmem_est(tile_b, dims_p, x_elem_bytes):
    d_in_p, h1_p, h2_p, d_out_p = dims_p
    w = (d_in_p * h1_p + h1_p * h2_p + h2_p * d_out_p) * 2 + (h1_p + h2_p + d_out_p) * 4
    t = tile_b * d_in_p * x_elem_bytes + tile_b * d_out_p * 4
    # Assume the pipeliner double-buffers everything (grid-invariant weights included).
    # TODO(synk): single-buffer the grid-invariant weight/bias operands (pl.Buffered(1))
    # once that is reliably honored by pallas_call, halving the resident weight footprint.
    return 2 * (w + t) + (2 << 20)


def _ktiled_vmem_est(tile_b, tile_k, dims_p, x_elem_bytes):
    d_in_p, h1_p, h2_p, d_out_p = dims_p
    w_res = (h1_p * h2_p + h2_p * d_out_p) * 2 + (h1_p + h2_p + d_out_p) * 4
    stream = tile_b * tile_k * x_elem_bytes + tile_k * h1_p * 2 + tile_b * d_out_p * 4
    scratch = tile_b * h1_p * 4
    return 2 * (w_res + stream) + scratch + (2 << 20)


# ---------------------------------------------------------------------------
# Parameter preparation (pad + cast ONCE, reuse across calls)
# ---------------------------------------------------------------------------
def prepare_params(params, compute_dtype=jnp.bfloat16):
    w1, b1, w2, b2, w3, b3 = params
    b1, b2, b3 = (b.reshape(1, -1) for b in (b1, b2, b3))
    d_in, h1 = w1.shape
    h2 = w2.shape[1]
    d_out = w3.shape[1]
    d_in_p, h1_p, h2_p, d_out_p = (_round_up(d, 128) for d in (d_in, h1, h2, d_out))

    def pad2(a, r, c):
        return jnp.pad(a, ((0, r - a.shape[0]), (0, c - a.shape[1])))

    return {
        "dims": (d_in, h1, h2, d_out),
        "dims_p": (d_in_p, h1_p, h2_p, d_out_p),
        "w1": pad2(w1.astype(compute_dtype), d_in_p, h1_p),
        "b1": pad2(b1.astype(jnp.float32), 1, h1_p),
        "w2": pad2(w2.astype(compute_dtype), h1_p, h2_p),
        "b2": pad2(b2.astype(jnp.float32), 1, h2_p),
        "w3": pad2(w3.astype(compute_dtype), h2_p, d_out_p),
        "b3": pad2(b3.astype(jnp.float32), 1, d_out_p),
    }


# ---------------------------------------------------------------------------
# Wrapper
# ---------------------------------------------------------------------------
def mlp_pallas(x, prep, *, tile_b=None, tile_k=None):
    d_in, h1, h2, d_out = prep["dims"]
    dims_p = d_in_p, h1_p, h2_p, d_out_p = prep["dims_p"]
    B, xd = x.shape
    assert xd == d_in, f"x feature dim {xd} != {d_in}"

    if tile_b is None:
        tile_b = _pick_tile_b(B)
    tile_b = max(16, _round_up(min(int(tile_b), _round_up(B, 16)), 16))

    budget = _vmem_capacity_bytes() - (8 << 20)   # leave headroom for compiler scratch

    def x_bytes(tb):
        aligned = (d_in == d_in_p) and (B % tb == 0)
        return (x.dtype.itemsize if aligned else 2), aligned

    use_ktile = tile_k is not None

    if not use_ktile:
        xb, _ = x_bytes(tile_b)
        est = _resident_vmem_est(tile_b, dims_p, xb)
        # Prefer shrinking the batch tile before streaming W1.
        while est > budget and tile_b > 64:
            tile_b = max(64, _round_up(tile_b // 2, 16))
            xb, _ = x_bytes(tile_b)
            est = _resident_vmem_est(tile_b, dims_p, xb)
        use_ktile = est > budget

    if use_ktile:
        if tile_k is None:
            tile_k = _pick_tile_k(d_in_p, 512)
        xb, _ = x_bytes(tile_b)
        est = _ktiled_vmem_est(tile_b, tile_k, dims_p, xb)
        while est > budget and tile_b > 16:
            tile_b = max(16, _round_up(tile_b // 2, 16))
            xb, _ = x_bytes(tile_b)
            est = _ktiled_vmem_est(tile_b, tile_k, dims_p, xb)
        while est > budget and tile_k > 128:
            tile_k = _pick_tile_k(d_in_p, tile_k // 2)
            est = _ktiled_vmem_est(tile_b, tile_k, dims_p, xb)
        # TODO(synk): if even (tile_b=16, tile_k=128) exceeds VMEM (input_size >~ 15k) also
        # tile the layer-2/3 weights instead of keeping them resident.

    B_p = _round_up(B, tile_b)
    xb, aligned = x_bytes(tile_b)
    if aligned:
        xp = x  # DMA f32 straight in; bf16 cast happens inside the kernel.
    else:
        xp = jnp.pad(x.astype(prep["w1"].dtype), ((0, B_p - B), (0, d_in_p - d_in)))

    flops = 2 * B_p * (d_in_p * h1_p + h1_p * h2_p + h2_p * d_out_p)
    bytes_accessed = (
        B_p * d_in_p * xb
        + (d_in_p * h1_p + h1_p * h2_p + h2_p * d_out_p) * 2
        + (h1_p + h2_p + d_out_p) * 4
        + B_p * d_out_p * 4
    )
    cost = pl.CostEstimate(flops=flops, transcendentals=0, bytes_accessed=bytes_accessed)

    vmem_limit = int(min(est, budget)) if est > (32 << 20) else None

    if not use_ktile:
        grid = (B_p // tile_b,)
        in_specs = [
            pl.BlockSpec((tile_b, d_in_p), lambda i: (i, 0)),
            pl.BlockSpec((d_in_p, h1_p), lambda i: (0, 0)),
            pl.BlockSpec((1, h1_p), lambda i: (0, 0)),
            pl.BlockSpec((h1_p, h2_p), lambda i: (0, 0)),
            pl.BlockSpec((1, h2_p), lambda i: (0, 0)),
            pl.BlockSpec((h2_p, d_out_p), lambda i: (0, 0)),
            pl.BlockSpec((1, d_out_p), lambda i: (0, 0)),
        ]
        out_specs = pl.BlockSpec((tile_b, d_out_p), lambda i: (i, 0))
        scratch_shapes = ()
        kernel = _mlp_kernel_resident
        dim_sem = ("parallel",)
    else:
        grid = (B_p // tile_b, d_in_p // tile_k)
        in_specs = [
            pl.BlockSpec((tile_b, tile_k), lambda i, k: (i, k)),
            pl.BlockSpec((tile_k, h1_p), lambda i, k: (k, 0)),
            pl.BlockSpec((1, h1_p), lambda i, k: (0, 0)),
            pl.BlockSpec((h1_p, h2_p), lambda i, k: (0, 0)),
            pl.BlockSpec((1, h2_p), lambda i, k: (0, 0)),
            pl.BlockSpec((h2_p, d_out_p), lambda i, k: (0, 0)),
            pl.BlockSpec((1, d_out_p), lambda i, k: (0, 0)),
        ]
        out_specs = pl.BlockSpec((tile_b, d_out_p), lambda i, k: (i, 0))
        scratch_shapes = (pltpu.VMEM((tile_b, h1_p), jnp.float32),)
        kernel = _mlp_kernel_ktiled
        dim_sem = ("parallel", "arbitrary")

    out_padded = pl.pallas_call(
        kernel,
        out_shape=jax.ShapeDtypeStruct((B_p, d_out_p), jnp.float32),
        grid_spec=pltpu.PrefetchScalarGridSpec(
            num_scalar_prefetch=0,
            grid=grid,
            in_specs=in_specs,
            out_specs=out_specs,
            scratch_shapes=scratch_shapes,
        ),
        compiler_params=pltpu.CompilerParams(
            dimension_semantics=dim_sem,
            vmem_limit_bytes=vmem_limit,
        ),
        cost_estimate=cost,
    )(xp, prep["w1"], prep["b1"], prep["w2"], prep["b2"], prep["w3"], prep["b3"])

    # Slice off batch / lane padding.
    return out_padded[:B, :d_out]


# ---------------------------------------------------------------------------
# Reference + synthetic init
# ---------------------------------------------------------------------------
def init_params(key, input_size, common_size, dtype=jnp.float32):
    """Deterministic synthetic init (PyTorch nn.Linear shapes, stored transposed as (in, out))."""
    h1 = input_size // 2
    h2 = input_size // 4
    k = jax.random.split(key, 6)

    def lin(kw, kb, fan_in, fan_out):
        bound = 1.0 / jnp.sqrt(fan_in)
        w = jax.random.uniform(kw, (fan_in, fan_out), dtype, -bound, bound)
        b = jax.random.uniform(kb, (1, fan_out), dtype, -bound, bound)
        return w, b

    w1, b1 = lin(k[0], k[1], input_size, h1)
    w2, b2 = lin(k[2], k[3], h1, h2)
    w3, b3 = lin(k[4], k[5], h2, common_size)
    return (w1, b1, w2, b2, w3, b3)


def mlp_reference(x, params, compute_dtype=jnp.float32):
    w1, b1, w2, b2, w3, b3 = params

    def lin(h, w, b):
        return jnp.dot(h.astype(compute_dtype), w.astype(compute_dtype),
                       preferred_element_type=jnp.float32) + b.astype(jnp.float32)

    h = jnp.maximum(lin(x, w1, b1), 0.0)
    h = jnp.maximum(lin(h, w2, b2), 0.0)
    return lin(h, w3, b3)


if __name__ == "__main__":
    key = jax.random.PRNGKey(0)
    kx, kp, kx2, kp2 = jax.random.split(key, 4)

    # ---- Case 1: module's own shapes; aligned fast path (f32 x straight in), resident weights,
    #      single fat batch tile (grid of 1 step). ----
    B, input_size, common_size = 64, 128, 32      # -> hidden 64 -> hidden 32
    x = jax.random.normal(kx, (B, input_size), dtype=jnp.float32)
    params = init_params(kp, input_size, common_size)
    prep = prepare_params(params)                 # pad + bf16-cast weights ONCE, reuse across calls

    out = jax.block_until_ready(mlp_pallas(x, prep))
    assert out.shape == (B, common_size)
    assert out.dtype == jnp.float32

    ref_bf16 = mlp_reference(x, params, compute_dtype=jnp.bfloat16)
    assert jnp.allclose(out, ref_bf16, atol=2e-3, rtol=2e-3), "mismatch vs bf16-matched reference"
    ref_f32 = mlp_reference(x, params, compute_dtype=jnp.float32)
    assert jnp.allclose(out, ref_f32, atol=5e-2, rtol=5e-2), "mismatch vs f32 reference"

    # ---- Case 2: exercise the K-tiled (streamed-W1) path + batch padding explicitly. ----
    B2, input_size2, common_size2 = 48, 256, 16
    x2 = jax.random.normal(kx2, (B2, input_size2), dtype=jnp.float32)
    params2 = init_params(kp2, input_size2, common_size2)
    prep2 = prepare_params(params2)
    out2 = jax.block_until_ready(mlp_pallas(x2, prep2, tile_b=32, tile_k=128))
    assert out2.shape == (B2, common_size2)
    ref2 = mlp_reference(x2, params2, compute_dtype=jnp.bfloat16)
    assert jnp.allclose(out2, ref2, atol=2e-3, rtol=2e-3), "mismatch vs bf16 reference (K-tiled path)"

    print("KERNEL_OK")
</pallas_src>

<mosaic_0001>
module attributes {stable_mosaic.version = 11 : i64} {
  func.func @_mlp_kernel_resident(%arg0: i32, %arg1: memref<64x128xf32, #tpu.memory_space<vmem>>, %arg2: memref<128x128xbf16, #tpu.memory_space<vmem>>, %arg3: memref<1x128xf32, #tpu.memory_space<vmem>>, %arg4: memref<128x128xbf16, #tpu.memory_space<vmem>>, %arg5: memref<1x128xf32, #tpu.memory_space<vmem>>, %arg6: memref<128x128xbf16, #tpu.memory_space<vmem>>, %arg7: memref<1x128xf32, #tpu.memory_space<vmem>>, %arg8: memref<64x128xf32, #tpu.memory_space<vmem>>) attributes {dimension_semantics = [#tpu.dimension_semantics<parallel>], iteration_bounds = array<i64: 1>, scalar_prefetch = 0 : i64, scratch_operands = 0 : i64, tpu.core_type = #tpu.core_type<tc>, window_params = [{transform_indices = @transform_0, window_bounds = array<i64: 64, 128>}, {pipeline_mode = #tpu.pipeline_mode<synchronous>, transform_indices = @transform_1, window_bounds = array<i64: 128, 128>}, {pipeline_mode = #tpu.pipeline_mode<synchronous>, transform_indices = @transform_2, window_bounds = array<i64: 1, 128>}, {pipeline_mode = #tpu.pipeline_mode<synchronous>, transform_indices = @transform_3, window_bounds = array<i64: 128, 128>}, {pipeline_mode = #tpu.pipeline_mode<synchronous>, transform_indices = @transform_4, window_bounds = array<i64: 1, 128>}, {pipeline_mode = #tpu.pipeline_mode<synchronous>, transform_indices = @transform_5, window_bounds = array<i64: 128, 128>}, {pipeline_mode = #tpu.pipeline_mode<synchronous>, transform_indices = @transform_6, window_bounds = array<i64: 1, 128>}, {transform_indices = @transform_7, window_bounds = array<i64: 64, 128>}]} {
    %c0 = arith.constant 0 : index
    %c0_0 = arith.constant 0 : index
    %0 = vector.load %arg1[%c0, %c0_0] : memref<64x128xf32, #tpu.memory_space<vmem>>, vector<64x128xf32>
    %1 = arith.truncf %0 : vector<64x128xf32> to vector<64x128xbf16>
    %c0_1 = arith.constant 0 : index
    %c0_2 = arith.constant 0 : index
    %2 = vector.load %arg2[%c0_1, %c0_2] : memref<128x128xbf16, #tpu.memory_space<vmem>>, vector<128x128xbf16>
    %cst = arith.constant dense<0.000000e+00> : vector<64x128xf32>
    %3 = tpu.matmul %1, %2, %cst {dimension_numbers = #tpu.dot_dimension_numbers<[1], [0], [0], [1], [0, 0, 1, 1], [], []>} : vector<64x128xbf16>, vector<128x128xbf16>, vector<64x128xf32> -> vector<64x128xf32>
    %c0_3 = arith.constant 0 : index
    %c0_4 = arith.constant 0 : index
    %4 = vector.load %arg3[%c0_3, %c0_4] : memref<1x128xf32, #tpu.memory_space<vmem>>, vector<1x128xf32>
    %5 = vector.broadcast %4 : vector<1x128xf32> to vector<64x128xf32>
    %6 = arith.addf %3, %5 : vector<64x128xf32>
    %cst_5 = arith.constant 0.000000e+00 : f32
    %7 = vector.broadcast %cst_5 : f32 to vector<64x128xf32>
    %8 = arith.maximumf %6, %7 : vector<64x128xf32>
    %9 = arith.truncf %8 : vector<64x128xf32> to vector<64x128xbf16>
    %c0_6 = arith.constant 0 : index
    %c0_7 = arith.constant 0 : index
    %10 = vector.load %arg4[%c0_6, %c0_7] : memref<128x128xbf16, #tpu.memory_space<vmem>>, vector<128x128xbf16>
    %cst_8 = arith.constant dense<0.000000e+00> : vector<64x128xf32>
    %11 = tpu.matmul %9, %10, %cst_8 {dimension_numbers = #tpu.dot_dimension_numbers<[1], [0], [0], [1], [0, 0, 1, 1], [], []>} : vector<64x128xbf16>, vector<128x128xbf16>, vector<64x128xf32> -> vector<64x128xf32>
    %c0_9 = arith.constant 0 : index
    %c0_10 = arith.constant 0 : index
    %12 = vector.load %arg5[%c0_9, %c0_10] : memref<1x128xf32, #tpu.memory_space<vmem>>, vector<1x128xf32>
    %13 = vector.broadcast %12 : vector<1x128xf32> to vector<64x128xf32>
    %14 = arith.addf %11, %13 : vector<64x128xf32>
    %cst_11 = arith.constant 0.000000e+00 : f32
    %15 = vector.broadcast %cst_11 : f32 to vector<64x128xf32>
    %16 = arith.maximumf %14, %15 : vector<64x128xf32>
    %17 = arith.truncf %16 : vector<64x128xf32> to vector<64x128xbf16>
    %c0_12 = arith.constant 0 : index
    %c0_13 = arith.constant 0 : index
    %18 = vector.load %arg6[%c0_12, %c0_13] : memref<128x128xbf16, #tpu.memory_space<vmem>>, vector<128x128xbf16>
    %cst_14 = arith.constant dense<0.000000e+00> : vector<64x128xf32>
    %19 = tpu.matmul %17, %18, %cst_14 {dimension_numbers = #tpu.dot_dimension_numbers<[1], [0], [0], [1], [0, 0, 1, 1], [], []>} : vector<64x128xbf16>, vector<128x128xbf16>, vector<64x128xf32> -> vector<64x128xf32>
    %c0_15 = arith.constant 0 : index
    %c0_16 = arith.constant 0 : index
    %20 = vector.load %arg7[%c0_15, %c0_16] : memref<1x128xf32, #tpu.memory_space<vmem>>, vector<1x128xf32>
    %21 = vector.broadcast %20 : vector<1x128xf32> to vector<64x128xf32>
    %22 = arith.addf %19, %21 : vector<64x128xf32>
    %c0_17 = arith.constant 0 : index
    %c0_18 = arith.constant 0 : index
    %23 = vector.load %arg8[%c0_17, %c0_18] : memref<64x128xf32, #tpu.memory_space<vmem>>, vector<64x128xf32>
    tpu.vector_store %arg8[%c0_17, %c0_18], %22 {strides = array<i32>} : memref<64x128xf32, #tpu.memory_space<vmem>>, vector<64x128xf32>,
    return
  }
  func.func @transform_0(%arg0: i32) -> (i32, i32) {
    %c0_i32 = arith.constant 0 : i32
    %c0_i32_0 = arith.constant 0 : i32
    return %arg0, %c0_i32 : i32, i32
  }
  func.func @transform_1(%arg0: i32) -> (i32, i32) {
    %c0_i32 = arith.constant 0 : i32
    %c0_i32_0 = arith.constant 0 : i32
    %c0_i32_1 = arith.constant 0 : i32
    return %c0_i32, %c0_i32_0 : i32, i32
  }
  func.func @transform_2(%arg0: i32) -> (i32, i32) {
    %c0_i32 = arith.constant 0 : i32
    %c0_i32_0 = arith.constant 0 : i32
    %c0_i32_1 = arith.constant 0 : i32
    return %c0_i32, %c0_i32_0 : i32, i32
  }
  func.func @transform_3(%arg0: i32) -> (i32, i32) {
    %c0_i32 = arith.constant 0 : i32
    %c0_i32_0 = arith.constant 0 : i32
    %c0_i32_1 = arith.constant 0 : i32
    return %c0_i32, %c0_i32_0 : i32, i32
  }
  func.func @transform_4(%arg0: i32) -> (i32, i32) {
    %c0_i32 = arith.constant 0 : i32
    %c0_i32_0 = arith.constant 0 : i32
    %c0_i32_1 = arith.constant 0 : i32
    return %c0_i32, %c0_i32_0 : i32, i32
  }
  func.func @transform_5(%arg0: i32) -> (i32, i32) {
    %c0_i32 = arith.constant 0 : i32
    %c0_i32_0 = arith.constant 0 : i32
    %c0_i32_1 = arith.constant 0 : i32
    return %c0_i32, %c0_i32_0 : i32, i32
  }
  func.func @transform_6(%arg0: i32) -> (i32, i32) {
    %c0_i32 = arith.constant 0 : i32
    %c0_i32_0 = arith.constant 0 : i32
    %c0_i32_1 = arith.constant 0 : i32
    return %c0_i32, %c0_i32_0 : i32, i32
  }
  func.func @transform_7(%arg0: i32) -> (i32, i32) {
    %c0_i32 = arith.constant 0 : i32
    %c0_i32_0 = arith.constant 0 : i32
    return %arg0, %c0_i32 : i32, i32
  }
}

</mosaic_0001>

<bundles_post_ra>
// kernel: tpu_custom_call.1
= control target key start
LH: loop header
LB: loop body
LE: loop exit
PB: predicated region body
PF: predicated region fallthrough
CT: control target
= control target key end

     0   :  { %12 = vsyncpa [#allocation3], 0  ;;  %s934_s0 = inlined_call_operand.hbm [shape: f32[64,128], index: 0, kind: input, shape index: {}]   ;;  %s935_s1 = inlined_call_operand.hbm [shape: bf16[128,128], index: 1, kind: input, shape index: {}]   ;;  %s936_s2 = inlined_call_operand.vmem [shape: f32[1,128], index: 2, kind: input, shape index: {}]   ;;  %s937_s3 = inlined_call_operand.hbm [shape: bf16[128,128], index: 3, kind: input, shape index: {}]   ;;  %s938_s4 = inlined_call_operand.vmem [shape: f32[1,128], index: 4, kind: input, shape index: {}]   ;;  %s939_s5 = inlined_call_operand.hbm [shape: bf16[128,128], index: 5, kind: input, shape index: {}]   ;;  %s940_s6 = inlined_call_operand.vmem [shape: f32[1,128], index: 6, kind: input, shape index: {}]   ;;  %s941_s7 = inlined_call_operand.hbm [shape: f32[64,128], index: 7, kind: output, shape index: {}]  }
   0x1   :  { %13 = vsyncpa [#allocation6], 0 }
   0x2   :  { %14 = vsyncpa [#allocation9], 0 }
   0x3   :  { %15 = vsyncpa [#allocation4], 0  ;;  %s846_s24 = smov [#allocation5]  }
   0x4   :  { %s33_s25 = sshll.u32 %s846_s24, 4  ;;  %s34_s25 = int_to_ptr.vmem [resolvable:$true] %s33_s25 }
   0x5   :  { %s746_s26 = scalar_lea.vmem %s34_s25, 1024  ;;  %p751_p1 = scmp.lt.s32.totalorder %s34_s25, %s34_s25 }
   0x6   :  { %p747_p0 = scmp.ne.s32.totalorder %s34_s25, %s746_s26  ;;  %p752_p2 = scmp.lt.s32.totalorder %s746_s26, %s746_s26 }
   0x8   :  { %p753_p3 = por %p752_p2, %p751_p1 }
   0xa   :  { %p754_p4 = pnand %p753_p3, %p747_p0 }
   0xc   :  { %757 = shalt.err (!%p754_p4)
}
   0xd   :  { %s847_s27 = smov 64   ;;  %s848_s28 = smov 4  }
   0xe   :  { %39 = dma.hbm_to_vmem [thread:$0]  %s935_s1, 1024, %s34_s25, [#allocation6], %s847_s27, %s847_s27, %s848_s28  }
   0xf   :  { %s849_s8 = smov [#allocation2]  }
  0x10   :  { %s21_s9 = sshll.u32 %s849_s8, 4  ;;  %s22_s9 = int_to_ptr.vmem [resolvable:$true] %s21_s9 }
  0x11   :  { %s766_s10 = scalar_lea.vmem %s22_s9, 1024  ;;  %p771_p6 = scmp.lt.s32.totalorder %s22_s9, %s22_s9 }
  0x12   :  { %p767_p5 = scmp.ne.s32.totalorder %s22_s9, %s766_s10  ;;  %p772_p7 = scmp.lt.s32.totalorder %s766_s10, %s766_s10 }
  0x14   :  { %p773_p8 = por %p772_p7, %p771_p6 }
  0x16   :  { %p774_p9 = pnand %p773_p8, %p767_p5 }
  0x18   :  { %777 = shalt.err (!%p774_p9)
}
  0x19   :  { %s850_s11 = smov 128   ;;  %s851_s12 = smov 8  }
  0x1a   :  { %27 = dma.hbm_to_vmem [thread:$0]  %s934_s0, 1024, %s22_s9, [#allocation3], %s850_s11, %s850_s11, %s851_s12  }
  0x1b   :  { %s852_s1 = smov [#allocation7]   ;;  %s853_s16 = smov [#allocation8]  }
  0x1c   :  { %s47_s15 = sshll.u32 %s852_s1, 4  ;;  %s61_s17 = sshll.u32 %s853_s16, 4  ;;  %s48_s15 = int_to_ptr.vmem [resolvable:$true] %s47_s15  ;;  %s62_s17 = int_to_ptr.vmem [resolvable:$true] %s61_s17 }
  0x1d   :  { %s786_s18 = scalar_lea.vmem %s48_s15, 1024  ;;  %p791_p11 = scmp.lt.s32.totalorder %s48_s15, %s48_s15 }
  0x1e   :  { %p787_p10 = scmp.ne.s32.totalorder %s48_s15, %s786_s18  ;;  %p792_p12 = scmp.lt.s32.totalorder %s786_s18, %s786_s18 }
  0x20   :  { %p793_p13 = por %p792_p12, %p791_p11 }
  0x22   :  { %p794_p0 = pnand %p793_p13, %p787_p10 }
  0x24   :  { %797 = shalt.err (!%p794_p0)
}
  0x25   :  { %53 = dma.hbm_to_vmem [thread:$0]  %s937_s3, 1024, %s48_s15, [#allocation6], %s847_s27, %s847_s27, %s848_s28  }
  0x26   :  { %s806_s0 = scalar_lea.vmem %s62_s17, 1024  ;;  %p811_p2 = scmp.lt.s32.totalorder %s62_s17, %s62_s17 }
  0x27   :  { %p807_p1 = scmp.ne.s32.totalorder %s62_s17, %s806_s0  ;;  %p812_p3 = scmp.lt.s32.totalorder %s806_s0, %s806_s0 }
  0x29   :  { %p813_p4 = por %p812_p3, %p811_p2 }
  0x2b   :  { %p814_p5 = pnand %p813_p4, %p807_p1 }
  0x2d   :  { %817 = shalt.err (!%p814_p5)
}
  0x2e   :  { %67 = dma.hbm_to_vmem [thread:$0]  %s939_s5, 1024, %s62_s17, [#allocation9], %s847_s27, %s847_s27, %s848_s28  }
  0x2f   :  { %838 = dma.done.wait [#allocation3], 1024  }
  0x30   :  { %839 = vsyncadd [#allocation3], 4294966272 }
  0x31   :  { %840 = dma.done.wait [#allocation6], 2048  }
  0x32   :  { %841 = vsyncadd [#allocation6], 4294965248 }
  0x33   :  { %842 = dma.done.wait [#allocation9], 1024  }
  0x34   :  { %843 = vsyncadd [#allocation9], 4294966272  ;;  %v714_v0 = vld [vmem:[#allocation5 + $0x38] sm:$0xff]   ;;  %v715_v1 = vld [vmem:[#allocation5 + $0x30] sm:$0xff]   ;;  %s854_s25 = smov [#allocation10]  }
  0x35   :  { %617 = vmatprep.subr.bf16.mxu0 %v714_v0  ;;  %v716_v2 = vld [vmem:[#allocation5 + $0x28] sm:$0xff]   ;;  %v717_v3 = vld [vmem:[#allocation5 + $0x20] sm:$0xff]   ;;  %v718_v7 = vld [vmem:[#allocation5 + $0x18] sm:$0xff]  }
  0x36   :  { %618 = vmatpush3.bf16.msra.mxu0 %v714_v0  ;;  %v83_v4 = vld [vmem:[#allocation2] sm:$0xff]  ;;  %v84_v5 = vld [vmem:[#allocation2 + $0x8] sm:$0xff]  ;;  %v722_v8 = vld [vmem:[#allocation7 + $0x38] sm:$0xff]  }
  0x37   :  { %619 = vmatprep.subr.bf16.mxu0 %v715_v1  ;;  %v91_v6 = vpack.c.bf16 %v84_v5, %v83_v4  ;;  %v723_v9 = vld [vmem:[#allocation7 + $0x30] sm:$0xff]   ;;  %641 = vmatprep.subr.bf16.mxu1 %v722_v8  ;;  %v724_v11 = vld [vmem:[#allocation7 + $0x28] sm:$0xff]   ;;  %v725_v12 = vld [vmem:[#allocation7 + $0x20] sm:$0xff]  }
  0x38   :  { %v719_v10 = vld [vmem:[#allocation5 + $0x10] sm:$0xff]   ;;  %642 = vmatpush3.bf16.msra.mxu1 %v722_v8  ;;  %v720_v13 = vld [vmem:[#allocation5 + $0x8] sm:$0xff]   ;;  %v726_v14 = vld [vmem:[#allocation7 + $0x18] sm:$0xff]  }
  0x39   :  { %633 = vmatprep.mubr.bf16.mxu0 %v91_v6  ;;  %643 = vmatprep.subr.bf16.mxu1 %v723_v9  ;;  %v721_v15 = vld [vmem:[#allocation5] sm:$0xff]   ;;  %v85_v16 = vld [vmem:[#allocation2 + $0x10] sm:$0xff]  ;;  %v86_v17 = vld [vmem:[#allocation2 + $0x18] sm:$0xff] }
  0x3a   :  { %620 = vmatpush3.bf16.msra.mxu0 %v715_v1  ;;  %v87_v18 = vld [vmem:[#allocation2 + $0x20] sm:$0xff]  ;;  %v88_v19 = vld [vmem:[#allocation2 + $0x28] sm:$0xff]  ;;  %v92_v20 = vpack.c.bf16 %v86_v17, %v85_v16  ;;  %v89_v22 = vld [vmem:[#allocation2 + $0x30] sm:$0xff] }
  0x3b   :  { %621 = vmatprep.subr.bf16.mxu0 %v716_v2  ;;  %v93_v21 = vpack.c.bf16 %v88_v19, %v87_v18  ;;  %v90_v23 = vld [vmem:[#allocation2 + $0x38] sm:$0xff]  ;;  %v727_v25 = vld [vmem:[#allocation7 + $0x10] sm:$0xff]   ;;  %v728_v26 = vld [vmem:[#allocation7 + $0x8] sm:$0xff]  }
  0x3c   :  { %644 = vmatpush3.bf16.msra.mxu1 %v723_v9  ;;  %v94_v24 = vpack.c.bf16 %v90_v23, %v89_v22  ;;  %v729_v27 = vld [vmem:[#allocation7] sm:$0xff]   ;;  %v730_v28 = vld [vmem:[#allocation8 + $0x38] sm:$0xff]   ;;  %v731_v29 = vld [vmem:[#allocation8 + $0x30] sm:$0xff]  }
  0x3d   :  { %645 = vmatprep.subr.bf16.mxu1 %v724_v11  ;;  %v732_v30 = vld [vmem:[#allocation8 + $0x28] sm:$0xff]   ;;  %v733_v31 = vld [vmem:[#allocation8 + $0x20] sm:$0xff]   ;;  %v734_v32 = vld [vmem:[#allocation8 + $0x18] sm:$0xff]  }
  0x3e   :  { %622 = vmatpush3.bf16.msra.mxu0 %v716_v2  ;;  %v554_v35 = vld [vmem:[%s936_s2] ss:$0 sm:$0xff]  ;;  %v735_v62 = vld [vmem:[#allocation8 + $0x10] sm:$0xff]   ;;  %v736_v63 = vld [vmem:[#allocation8 + $0x8] sm:$0xff]  }
  0x3f   :  { %623 = vmatprep.subr.bf16.mxu0 %v717_v3  ;;  %v737_v0 = vld [vmem:[#allocation8] sm:$0xff]  }
  0x40   :  { %646 = vmatpush3.bf16.msra.mxu1 %v724_v11 }
  0x41   :  { %647 = vmatprep.subr.bf16.mxu1 %v725_v12 }
  0x42   :  { %624 = vmatpush3.bf16.msra.mxu0 %v717_v3  ;;  %v563_v3 = vld [vmem:[%s938_s4] ss:$0 sm:$0xff] }
  0x43   :  { %625 = vmatprep.subr.bf16.mxu0 %v718_v7 }
  0x44   :  { %648 = vmatpush3.bf16.msra.mxu1 %v725_v12 }
  0x45   :  { %649 = vmatprep.subr.bf16.mxu1 %v726_v14 }
  0x46   :  { %626 = vmatpush3.bf16.msra.mxu0 %v718_v7 }
  0x47   :  { %627 = vmatprep.subr.bf16.mxu0 %v719_v10 }
  0x48   :  { %650 = vmatpush3.bf16.msra.mxu1 %v726_v14 }
  0x49   :  { %651 = vmatprep.subr.bf16.mxu1 %v727_v25 }
  0x4a   :  { %628 = vmatpush3.bf16.msra.mxu0 %v719_v10 }
  0x4b   :  { %629 = vmatprep.subr.bf16.mxu0 %v720_v13 }
  0x4c   :  { %652 = vmatpush3.bf16.msra.mxu1 %v727_v25 }
  0x4d   :  { %653 = vmatprep.subr.bf16.mxu1 %v728_v26 }
  0x4e   :  { %630 = vmatpush3.bf16.msra.mxu0 %v720_v13 }
  0x4f   :  { %631 = vmatprep.subr.bf16.mxu0 %v721_v15 }
  0x50   :  { %654 = vmatpush3.bf16.msra.mxu1 %v728_v26 }
  0x51   :  { %655 = vmatprep.subr.bf16.mxu1 %v729_v27 }
  0x52   :  { %632 = vmatpush3.bf16.msra.mxu0 %v721_v15 }
  0x53   :  { %665 = vmatprep.subr.bf16.mxu0 %v730_v28 }
  0x54   :  { %656 = vmatpush3.bf16.msra.mxu1 %v729_v27 }
  0x55   :  { %634 = vmatmul.mubr.bf16.vlgmr.msra.gmra.mxu0 %v92_v20  ;;  %689 = vmatprep.subr.bf16.mxu1 %v730_v28 }
  0x56   :  { %637 = vmatprep.mubr.bf16.mxu0 %v93_v21  ;;  %666 = vmatpush3.bf16.msra.mxu0 %v730_v28 }
  0x57   :  { %667 = vmatprep.subr.bf16.mxu0 %v731_v29 }
  0x5a   :  { %668 = vmatpush3.bf16.msra.mxu0 %v731_v29 }
  0x5b   :  { %669 = vmatprep.subr.bf16.mxu0 %v732_v30 }
  0x5d   :  { %638 = vmatmul.mubr.bf16.gmra.mxu0 %v94_v24 }
  0x5e   :  { %670 = vmatpush3.bf16.msra.mxu0 %v732_v30 }
  0x5f   :  { %671 = vmatprep.subr.bf16.mxu0 %v733_v31 }
  0x62   :  { %672 = vmatpush3.bf16.msra.mxu0 %v733_v31 }
  0x63   :  { %673 = vmatprep.subr.bf16.mxu0 %v734_v32 }
  0x66   :  { %674 = vmatpush3.bf16.msra.mxu0 %v734_v32 }
  0x67   :  { %675 = vmatprep.subr.bf16.mxu0 %v735_v62 }
  0x6a   :  { %676 = vmatpush3.bf16.msra.mxu0 %v735_v62 }
  0x6b   :  { %677 = vmatprep.subr.bf16.mxu0 %v736_v63 }
  0x6e   :  { %678 = vmatpush3.bf16.msra.mxu0 %v736_v63 }
  0x6f   :  { %679 = vmatprep.subr.bf16.mxu0 %v737_v0 }
  0x72   :  { %680 = vmatpush3.bf16.msra.mxu0 %v737_v0 }
 0x115   :  { %v635_v33 = vpop.f32.mrf.mxu0 }
 0x116   :  { %v209_v39 = vadd.f32 %v635_v33, %v554_v35 }
 0x117   :  { %v200_v34 = vpop.f32.mrf.mxu0 }
 0x118   :  { %v201_v37 = vadd.f32 %v554_v35, %v200_v34  ;;  %v233_v46 = vmax.f32 %v209_v39, 0.0 }
 0x119   :  { %v636_v36 = vpop.f32.mrf.mxu0 }
 0x11a   :  { %v212_v38 = vadd.f32 %v636_v36, %v554_v35  ;;  %v231_v44 = vmax.f32 %v201_v37, 0.0 }
 0x11b   :  { %v203_v40 = vpop.f32.mrf.mxu0 }
 0x11c   :  { %v204_v41 = vadd.f32 %v554_v35, %v203_v40  ;;  %v234_v42 = vmax.f32 %v212_v38, 0.0 }
 0x11d   :  { %v639_v43 = vpop.f32.mrf.mxu0 }
 0x11e   :  { %v232_v45 = vmax.f32 %v204_v41, 0.0  ;;  %v240_v49 = vpack.c.bf16 %v234_v42, %v233_v46  ;;  %v225_v53 = vadd.f32 %v639_v43, %v554_v35 }
 0x11f   :  { %v216_v47 = vpop.f32.mrf.mxu0 }
 0x120   :  { %v239_v48 = vpack.c.bf16 %v232_v45, %v231_v44  ;;  %v217_v51 = vadd.f32 %v554_v35, %v216_v47  ;;  %v237_v59 = vmax.f32 %v225_v53, 0.0 }
 0x121   :  { %v640_v50 = vpop.f32.mrf.mxu0 }
 0x122   :  { %v228_v52 = vadd.f32 %v640_v50, %v554_v35  ;;  %657 = vmatprep.mubr.bf16.mxu1 %v239_v48  ;;  %v235_v57 = vmax.f32 %v217_v51, 0.0 }
 0x123   :  { %v219_v54 = vpop.f32.mrf.mxu0  ;;  %658 = vmatmul.mubr.bf16.vlgmr.msra.gmra.mxu1 %v240_v49 }
 0x124   :  { %v220_v55 = vadd.f32 %v554_v35, %v219_v54  ;;  %697 = vmatpush3.bf16.msra.mxu1 %v730_v28  ;;  %v238_v56 = vmax.f32 %v228_v52, 0.0 }
 0x125   :  { %690 = vmatprep.subr.bf16.mxu1 %v731_v29 }
 0x126   :  { %v236_v58 = vmax.f32 %v220_v55, 0.0  ;;  %v242_v61 = vpack.c.bf16 %v238_v56, %v237_v59 }
 0x128   :  { %v241_v60 = vpack.c.bf16 %v236_v58, %v235_v57  ;;  %698 = vmatpush3.bf16.msra.mxu1 %v731_v29 }
 0x129   :  { %691 = vmatprep.subr.bf16.mxu1 %v732_v30 }
 0x12a   :  { %661 = vmatprep.mubr.bf16.mxu1 %v241_v60 }
 0x12b   :  { %662 = vmatmul.mubr.bf16.gmra.mxu1 %v242_v61 }
 0x12c   :  { %699 = vmatpush3.bf16.msra.mxu1 %v732_v30  ;;  %v572_v30 = vld [vmem:[%s940_s6] ss:$0 sm:$0xff]  ;;  %s540_s6 = sshll.u32 %s854_s25, 4  ;;  %s541_s6 = int_to_ptr.vmem [resolvable:$true] %s540_s6 }
 0x12d   :  { %692 = vmatprep.subr.bf16.mxu1 %v733_v31  ;;  %s818_s26 = scalar_lea.vmem %s541_s6, 1024  ;;  %p823_p7 = scmp.lt.s32.totalorder %s541_s6, %s541_s6 }
 0x12e   :  { %p819_p6 = scmp.ne.s32.totalorder %s541_s6, %s818_s26  ;;  %p824_p8 = scmp.lt.s32.totalorder %s818_s26, %s818_s26 }
 0x130   :  { %700 = vmatpush3.bf16.msra.mxu1 %v733_v31  ;;  %p825_p9 = por %p824_p8, %p823_p7 }
 0x131   :  { %693 = vmatprep.subr.bf16.mxu1 %v734_v32 }
 0x132   :  { %p826_p10 = pnand %p825_p9, %p819_p6 }
 0x134   :  { %701 = vmatpush3.bf16.msra.mxu1 %v734_v32 }
 0x135   :  { %694 = vmatprep.subr.bf16.mxu1 %v735_v62 }
 0x138   :  { %702 = vmatpush3.bf16.msra.mxu1 %v735_v62 }
 0x139   :  { %695 = vmatprep.subr.bf16.mxu1 %v736_v63 }
 0x13c   :  { %703 = vmatpush3.bf16.msra.mxu1 %v736_v63 }
 0x13d   :  { %696 = vmatprep.subr.bf16.mxu1 %v737_v0 }
 0x140   :  { %704 = vmatpush3.bf16.msra.mxu1 %v737_v0 }
 0x1e3   :  { %v659_v1 = vpop.f32.mrf.mxu1 }
 0x1e4   :  { %v357_v7 = vadd.f32 %v659_v1, %v563_v3 }
 0x1e5   :  { %v348_v2 = vpop.f32.mrf.mxu1 }
 0x1e6   :  { %v349_v5 = vadd.f32 %v563_v3, %v348_v2  ;;  %v381_v14 = vmax.f32 %v357_v7, 0.0 }
 0x1e7   :  { %v660_v4 = vpop.f32.mrf.mxu1 }
 0x1e8   :  { %v360_v6 = vadd.f32 %v660_v4, %v563_v3  ;;  %v379_v12 = vmax.f32 %v349_v5, 0.0 }
 0x1e9   :  { %v351_v8 = vpop.f32.mrf.mxu1 }
 0x1ea   :  { %v352_v9 = vadd.f32 %v563_v3, %v351_v8  ;;  %v382_v10 = vmax.f32 %v360_v6, 0.0 }
 0x1eb   :  { %v663_v11 = vpop.f32.mrf.mxu1 }
 0x1ec   :  { %v380_v13 = vmax.f32 %v352_v9, 0.0  ;;  %v388_v17 = vpack.c.bf16 %v382_v10, %v381_v14  ;;  %v373_v21 = vadd.f32 %v663_v11, %v563_v3 }
 0x1ed   :  { %v364_v15 = vpop.f32.mrf.mxu1 }
 0x1ee   :  { %v387_v16 = vpack.c.bf16 %v380_v13, %v379_v12  ;;  %v365_v19 = vadd.f32 %v563_v3, %v364_v15  ;;  %v385_v27 = vmax.f32 %v373_v21, 0.0 }
 0x1ef   :  { %v664_v18 = vpop.f32.mrf.mxu1 }
 0x1f0   :  { %v376_v20 = vadd.f32 %v664_v18, %v563_v3  ;;  %681 = vmatprep.mubr.bf16.mxu0 %v387_v16  ;;  %v383_v25 = vmax.f32 %v365_v19, 0.0 }
 0x1f1   :  { %v367_v22 = vpop.f32.mrf.mxu1  ;;  %682 = vmatmul.mubr.bf16.vlgmr.msra.gmra.mxu0 %v388_v17 }
 0x1f2   :  { %v368_v23 = vadd.f32 %v563_v3, %v367_v22  ;;  %v386_v24 = vmax.f32 %v376_v20, 0.0 }
 0x1f4   :  { %v384_v26 = vmax.f32 %v368_v23, 0.0  ;;  %v390_v29 = vpack.c.bf16 %v386_v24, %v385_v27 }
 0x1f6   :  { %v389_v28 = vpack.c.bf16 %v384_v26, %v383_v25 }
 0x1f8   :  { %685 = vmatprep.mubr.bf16.mxu1 %v389_v28 }
 0x1f9   :  { %686 = vmatmul.mubr.bf16.vlgmr.msra.gmra.mxu1 %v390_v29 }
 0x2b1   :  { %v683_v31 = vpop.f32.mrf.mxu0 }
 0x2b2   :  { %v505_v32 = vadd.f32 %v683_v31, %v572_v30 }
 0x2b3   :  { %v496_v33 = vpop.f32.mrf.mxu0 }
 0x2b4   :  { %529 = vst [vmem:[#allocation10 + $0x10] sm:$0xff] %v505_v32  ;;  %v497_v34 = vadd.f32 %v572_v30, %v496_v33 }
 0x2b5   :  { %v684_v35 = vpop.f32.mrf.mxu0 }
 0x2b6   :  { %527 = vst [vmem:[#allocation10] sm:$0xff] %v497_v34  ;;  %v508_v36 = vadd.f32 %v684_v35, %v572_v30 }
 0x2b7   :  { %v499_v37 = vpop.f32.mrf.mxu0 }
 0x2b8   :  { %530 = vst [vmem:[#allocation10 + $0x18] sm:$0xff] %v508_v36  ;;  %v500_v38 = vadd.f32 %v572_v30, %v499_v37 }
 0x2b9   :  { %v687_v39 = vpop.f32.mrf.mxu1 }
 0x2ba   :  { %528 = vst [vmem:[#allocation10 + $0x8] sm:$0xff] %v500_v38  ;;  %v521_v40 = vadd.f32 %v687_v39, %v572_v30 }
 0x2bb   :  { %v512_v41 = vpop.f32.mrf.mxu1 }
 0x2bc   :  { %533 = vst [vmem:[#allocation10 + $0x30] sm:$0xff] %v521_v40  ;;  %v513_v42 = vadd.f32 %v572_v30, %v512_v41 }
 0x2bd   :  { %v688_v43 = vpop.f32.mrf.mxu1 }
 0x2be   :  { %531 = vst [vmem:[#allocation10 + $0x20] sm:$0xff] %v513_v42  ;;  %v524_v44 = vadd.f32 %v688_v43, %v572_v30 }
 0x2bf   :  { %v515_v45 = vpop.f32.mrf.mxu1 }
 0x2c0   :  { %534 = vst [vmem:[#allocation10 + $0x38] sm:$0xff] %v524_v44  ;;  %v516_v46 = vadd.f32 %v572_v30, %v515_v45 }
 0x2c2   :  { %532 = vst [vmem:[#allocation10 + $0x28] sm:$0xff] %v516_v46 }
 0x2c3   :  { %829 = shalt.err (!%p826_p10)
}
 0x2c4   :  { %546 = dma.vmem_to_hbm [thread:$0]  %s541_s6, 1024, %s941_s7, [#allocation4], %s850_s11, %s850_s11, %s851_s12  }
 0x2c5   :  { %844 = dma.done.wait [#allocation4], 1024  }
 0x2c6   :  { %845 = vsyncadd [#allocation4], 4294966272 }
 0x2c7   :  { %550 = vsyncpa [#allocation3], 1 }
 0x2c8   :  { %551 = vsyncpa [#allocation6], 1 }
 0x2c9   :  { %552 = vsyncpa [#allocation9], 1 }
 0x2ca   :  { %553 = vsyncpa [#allocation4], 1 }

</bundles_post_ra>
